<compile_context>
chip_gen: v7x
topology: tpu7x:2x2x1
jax: 0.10.0
libtpu: 0.0.40
codegen_flags: <defaults>
</compile_context>

<pallas_src>
import math

import jax
import jax.numpy as jnp
import numpy as np
from jax.experimental import pallas as pl
from jax.experimental.pallas import tpu as pltpu


def _make_kernel(num_rows: int, num_tokens: int, dim_model: int):
    scale = math.sqrt(dim_model)

    def kernel(ids_ref, emb_ref, pos_ref, out_ref):
        # ids_ref: (S*B, 1) int32  -- token ids already in (seq-major, batch-minor) order
        # emb_ref: (T, D)    f32   -- full embedding table (VMEM resident, tiny)
        # pos_ref: (S*B, D)  f32   -- PE rows pre-broadcast to output row order
        # out_ref: (S*B, D)  f32   -- row-major flattening of the (S, B, D) output
        ids = ids_ref[...]                                               # (S*B, 1)
        emb = emb_ref[...]                                               # (T, D)

        # On-chip one-hot row selector (out-of-range ids -> zero rows, not garbage).
        tok = jax.lax.broadcasted_iota(jnp.int32, (num_rows, num_tokens), 1)
        one_hot = (ids == tok).astype(emb.dtype)                         # (S*B, T)

        # Single MXU matmul gathers all S*B rows at once.
        rows = jnp.dot(one_hot, emb, preferred_element_type=jnp.float32)  # (S*B, D)

        # Fused sqrt(D) scale + PE add, one unmasked full-block store.
        out_ref[...] = (rows * scale + pos_ref[...]).astype(out_ref.dtype)

    return kernel


def qst_encoder_forward(qst, embedding, pe):
    """Pallas implementation of QstEncoder.forward (eval mode).

    qst:       (B, S) int32 token ids
    embedding: (num_tokens, D) float32 embedding table
    pe:        (max_len, D) float32 positional-encoding buffer
    returns:   (S, B, D) float32   (== permute(1, 0, 2) of the batch-first result)
    """
    B, S = qst.shape
    T, D = embedding.shape

    # Layout plumbing (trivial, XLA-side):
    #   * ids presented in (S, B) order so the kernel's row-major output is already
    #     the permuted (S, B, D) result -- 64 bytes of index data.
    #   * PE rows pre-broadcast to the (S*B, D) output row order (row s*B + b gets
    #     pe[b], reproducing the module's batch-indexed PE slice) -- ~2 KiB constant.
    ids_sb = qst.T.reshape(S * B, 1).astype(jnp.int32)
    pos_sb = jnp.broadcast_to(pe[:B][None, :, :], (S, B, D)).reshape(S * B, D)

    kernel = _make_kernel(S * B, T, D)

    out2d = pl.pallas_call(
        kernel,
        out_shape=jax.ShapeDtypeStruct((S * B, D), embedding.dtype),
        in_specs=[
            pl.BlockSpec(memory_space=pltpu.MemorySpace.VMEM),  # ids (S*B, 1)
            pl.BlockSpec(memory_space=pltpu.MemorySpace.VMEM),  # embedding table
            pl.BlockSpec(memory_space=pltpu.MemorySpace.VMEM),  # PE rows (S*B, D)
        ],
        out_specs=pl.BlockSpec(memory_space=pltpu.MemorySpace.VMEM),
    )(ids_sb, embedding, pos_sb)

    # Free, contiguity-preserving metadata reshape: (S*B, D) row-major == (S, B, D).
    return out2d.reshape(S, B, D)


if __name__ == "__main__":
    # Small, deterministic configuration consistent with the module.
    num_tokens, dim_model = 30, 32
    B, S = 2, 8
    max_len = 5000

    key = jax.random.PRNGKey(0)
    k_emb, k_ids = jax.random.split(key)

    # Deterministic "parameters" (synthetic, not a checkpoint).
    embedding = jax.random.normal(k_emb, (num_tokens, dim_model), dtype=jnp.float32)
    qst = jax.random.randint(k_ids, (B, S), 0, num_tokens, dtype=jnp.int32)

    # PositionalEncoding buffer (exactly as in the PyTorch __init__).
    position = jnp.arange(max_len, dtype=jnp.float32)[:, None]
    div_term = jnp.exp(
        jnp.arange(0, dim_model, 2, dtype=jnp.float32) * (-math.log(10000.0) / dim_model)
    )
    pe = jnp.zeros((max_len, dim_model), dtype=jnp.float32)
    pe = pe.at[:, 0::2].set(jnp.sin(position * div_term))
    pe = pe.at[:, 1::2].set(jnp.cos(position * div_term))

    # TODO(synk): dropout is treated as eval-mode identity (no RNG masking).
    out = qst_encoder_forward(qst, embedding, pe)
    out = jax.block_until_ready(out)

    # Pure-JAX reference (dropout = identity in eval mode).
    x = embedding[qst] * math.sqrt(dim_model)          # (B, S, D)
    x = x + pe[:B][:, None, :]                         # + pos_encoding[:B] (batch-indexed)
    ref = jnp.transpose(x, (1, 0, 2))                  # permute(1, 0, 2) -> (S, B, D)
    np.testing.assert_allclose(np.asarray(out), np.asarray(ref), rtol=1e-6, atol=1e-6)

    print("KERNEL_OK")
</pallas_src>

<mosaic_0001>
module attributes {stable_mosaic.version = 11 : i64} {
  func.func @kernel(%arg0: memref<16x1xi32, #tpu.memory_space<vmem>>, %arg1: memref<30x32xf32, #tpu.memory_space<vmem>>, %arg2: memref<16x32xf32, #tpu.memory_space<vmem>>, %arg3: memref<16x32xf32, #tpu.memory_space<vmem>>) attributes {dimension_semantics = [], scalar_prefetch = 0 : i64, scratch_operands = 0 : i64, tpu.core_type = #tpu.core_type<tc>} {
    %c0 = arith.constant 0 : index
    %c0_0 = arith.constant 0 : index
    %0 = vector.load %arg0[%c0, %c0_0] : memref<16x1xi32, #tpu.memory_space<vmem>>, vector<16x1xi32>
    %c0_1 = arith.constant 0 : index
    %c0_2 = arith.constant 0 : index
    %1 = vector.load %arg1[%c0_1, %c0_2] : memref<30x32xf32, #tpu.memory_space<vmem>>, vector<30x32xf32>
    %2 = tpu.iota {dimensions = array<i32: 1>} : vector<16x30xi32>
    %3 = vector.broadcast %0 : vector<16x1xi32> to vector<16x30xi32>
    %4 = arith.cmpi eq, %3, %2 : vector<16x30xi32>
    %5 = arith.extui %4 : vector<16x30xi1> to vector<16x30xi32>
    %6 = arith.sitofp %5 : vector<16x30xi32> to vector<16x30xf32>
    %cst = arith.constant dense<0.000000e+00> : vector<16x32xf32>
    %7 = tpu.matmul %6, %1, %cst {dimension_numbers = #tpu.dot_dimension_numbers<[1], [0], [0], [1], [0, 0, 1, 1], [], []>} : vector<16x30xf32>, vector<30x32xf32>, vector<16x32xf32> -> vector<16x32xf32>
    %cst_3 = arith.constant 5.65685415 : f32
    %8 = vector.broadcast %cst_3 : f32 to vector<16x32xf32>
    %9 = arith.mulf %7, %8 : vector<16x32xf32>
    %c0_4 = arith.constant 0 : index
    %c0_5 = arith.constant 0 : index
    %10 = vector.load %arg2[%c0_4, %c0_5] : memref<16x32xf32, #tpu.memory_space<vmem>>, vector<16x32xf32>
    %11 = arith.addf %9, %10 : vector<16x32xf32>
    %c0_6 = arith.constant 0 : index
    %c0_7 = arith.constant 0 : index
    %12 = vector.load %arg3[%c0_6, %c0_7] : memref<16x32xf32, #tpu.memory_space<vmem>>, vector<16x32xf32>
    tpu.vector_store %arg3[%c0_6, %c0_7], %11 {strides = array<i32>} : memref<16x32xf32, #tpu.memory_space<vmem>>, vector<16x32xf32>,
    return
  }
}

</mosaic_0001>

<bundles_post_ra>
// kernel: tpu_custom_call.1
= control target key start
LH: loop header
LB: loop body
LE: loop exit
PB: predicated region body
PF: predicated region fallthrough
CT: control target
= control target key end

     0   :  { %8 = vsyncpa [#allocation3], 0  ;;  %s318_s0 = inlined_call_operand.vmem [shape: s32[16,1], index: 0, kind: input, shape index: {}]   ;;  %s319_s1 = inlined_call_operand.hbm [shape: f32[30,32], index: 1, kind: input, shape index: {}]   ;;  %s320_s2 = inlined_call_operand.vmem [shape: f32[16,32], index: 2, kind: input, shape index: {}]   ;;  %s321_s3 = inlined_call_operand.hbm [shape: f32[16,32], index: 3, kind: output, shape index: {}]  }
   0x1   :  { %9 = vsyncpa [#allocation4], 0  ;;  %s249_s12 = smov [#allocation2]   ;;  %s201_s16 = scalar_lea.hbm %s319_s1, 512 }
   0x2   :  { %s17_s13 = sshll.u32 %s249_s12, 4  ;;  %p202_p0 = scmp.ne.s32.totalorder %s319_s1, %s201_s16  ;;  %s18_s13 = int_to_ptr.vmem [resolvable:$true] %s17_s13 }
   0x3   :  { %p205_p1 = scmp.lt.u32.totalorder %s201_s16, %s319_s1 }
   0x5   :  { %p207_p2 = pnand %p205_p1, %p202_p0 }
   0x7   :  { %210 = shalt.err (!%p207_p2)
}
   0x8   :  { %s211_s21 = scalar_lea.vmem %s18_s13, 512  ;;  %p216_p4 = scmp.lt.s32.totalorder %s18_s13, %s18_s13 }
   0x9   :  { %p212_p3 = scmp.ne.s32.totalorder %s18_s13, %s211_s21  ;;  %p217_p5 = scmp.lt.s32.totalorder %s211_s21, %s211_s21 }
   0xb   :  { %p218_p6 = por %p217_p5, %p216_p4 }
   0xd   :  { %p219_p7 = pnand %p218_p6, %p212_p3 }
   0xf   :  { %222 = shalt.err (!%p219_p7)
}
  0x10   :  { %s250_s22 = smov 128   ;;  %s251_s23 = smov 8  }
  0x11   :  { %23 = dma.hbm_to_vmem [thread:$0]  %s319_s1, 512, %s18_s13, [#allocation3], %s250_s22, %s250_s22, %s251_s23  }
  0x12   :  { %245 = dma.done.wait [#allocation3], 512  }
  0x13   :  { %246 = vsyncadd [#allocation3], 4294966784  ;;  %v252_v0 = vmov 0   ;;  %v29_v1 = vld [vmem:[%s318_s0] sm:$0xff]  ;;  %v32_v3 = vld [vmem:[#allocation2 + $0x8] sm:$0xff]  ;;  %vm56_vm0 = vcmask 1045504   ;;  %v35_v9 = vlaneseq }
  0x14   :  { %200 = vset.pattern.permute.xlu0 %v252_v0  ;;  %v31_v2 = vld [vmem:[#allocation2] sm:$0xff]  ;;  %v33_v4 = vld [vmem:[#allocation2 + $0x10] sm:$0xff]  ;;  %v34_v5 = vld [vmem:[#allocation2 + $0x18] sm:$0x3f]  ;;  %vm253_vm1 = vmmov 1   ;;  %vm49_vm3 = vcmask 244736  }
  0x15   :  { %38 = vperm.xlu0 %200, %v29_v1   ;;  %v30_v6 = vld [vmem:[%s318_s0 + $0x8] sm:$0xff]  ;;  %v183_v7 = vpack.c.bf16 %v32_v3, %v31_v2  ;;  %v187_v8 = vpack.c.bf16 %v34_v5, %v33_v4  ;;  %vm188_vm2 = vmpackc.low %vm56_vm0, %vm253_vm1  ;;  %v36_v10 = vand.u32 127, %v35_v9  ;;  %v254_v12 = vmov 0.0   ;;  %v137_v20 = vld [vmem:[%s320_s2] sm:$0xff]  ;;  %s255_s5 = smov [#allocation5]  }
  0x16   :  { %v138_v17 = vld [vmem:[%s320_s2 + $0x8] sm:$0xff]  ;;  %s149_s6 = sshll.u32 %s255_s5, 4  ;;  %vm141_vm6 = vcmask 261120   ;;  %s150_s6 = int_to_ptr.vmem [resolvable:$true] %s149_s6 }
  0x17   :  { %184 = vmatprep.subr.bf16.mxu0 %v183_v7  ;;  %s223_s7 = scalar_lea.vmem %s150_s6, 256  ;;  %p228_p9 = scmp.lt.s32.totalorder %s150_s6, %s150_s6 }
  0x18   :  { %186 = vmatpush3.bf16.msra.mxu0 %v183_v7  ;;  %p224_p8 = scmp.ne.s32.totalorder %s150_s6, %s223_s7  ;;  %p229_p10 = scmp.lt.s32.totalorder %s223_s7, %s223_s7 }
  0x19   :  { %41 = vperm.xlu0 %200, %v30_v6   ;;  %189 = vmatprep.subr.msk.bf16.mxu0 %vm188_vm2, %v187_v8 }
  0x1a   :  { %p230_p11 = por %p229_p10, %p228_p9 }
  0x1c   :  { %192 = vmatpush3.bf16.msk.msra.mxu0 %vm188_vm2, %v187_v8  ;;  %p231_p12 = pnand %p230_p11, %p224_p8 }
  0x94   :  { %v39_v11 = vpop.permute.xlu0 %38 }
  0x95   :  { %vm43_vm4 = vcmp.eq.s32.totalorder %v39_v11, %v36_v10 }
  0x96   :  { %v161_v13 = vsel %vm43_vm4, 1.0, %v254_v12 }
  0x97   :  { %180 = vmatprep.mubr.msk.f32.mxu0 %vm49_vm3, %v161_v13 }
  0x98   :  { %v42_v14 = vpop.permute.xlu0 %41 }
  0x99   :  { %vm44_vm5 = vcmp.eq.s32.totalorder %v42_v14, %v36_v10 }
  0x9a   :  { %v162_v15 = vsel %vm44_vm5, 1.0, %v254_v12 }
  0x9b   :  { %181 = vmatmul.mubr.msk.f32.vlgmr.msra.gmra.mrb[0].mxu0 %vm49_vm3, %v162_v15 }
 0x16e   :  { %v182_v16 = vpop.f32.mrb[0].mxu0 }
 0x16f   :  { %v136_v18 = vmul.f32 5.656854, %v182_v16  ;;  %v126_v19 = vpop.f32.mrb[1].mxu0 }
 0x170   :  { %v135_v21 = vmul.f32 5.656854, %v126_v19 }
 0x171   :  { %v140_v22 = vadd.f32 %v138_v17, %v136_v18 }
 0x172   :  { %v139_v23 = vadd.f32 %v137_v20, %v135_v21 }
 0x173   :  { %143 = vst.msk [vmem:[#allocation5 + $0x8] sm:$0xff] %vm141_vm6, %v140_v22 }
 0x174   :  { %142 = vst.msk [vmem:[#allocation5] sm:$0xff] %vm141_vm6, %v139_v23 }
 0x175   :  { %234 = shalt.err (!%p231_p12)
}
 0x176   :  { %s235_s2 = scalar_lea.hbm %s321_s3, 256 }
 0x177   :  { %p236_p13 = scmp.ne.s32.totalorder %s321_s3, %s235_s2  ;;  %p239_p0 = scmp.lt.u32.totalorder %s235_s2, %s321_s3 }
 0x179   :  { %p241_p1 = pnand %p239_p0, %p236_p13 }
 0x17b   :  { %244 = shalt.err (!%p241_p1)
}
 0x17c   :  { %155 = dma.vmem_to_hbm [thread:$0]  %s150_s6, 256, %s321_s3, [#allocation4], %s250_s22, %s250_s22, %s251_s23  }
 0x17d   :  { %247 = dma.done.wait [#allocation4], 256  }
 0x17e   :  { %248 = vsyncadd [#allocation4], 4294967040 }
 0x17f   :  { %159 = vsyncpa [#allocation3], 1 }
 0x180   :  { %160 = vsyncpa [#allocation4], 1 }

</bundles_post_ra>
